<compile_context>
chip_gen: v7x
topology: tpu7x:2x2x1
jax: 0.10.0
libtpu: 0.0.40
codegen_flags: <defaults>
</compile_context>

<pallas_src>
import math

import jax
import jax.numpy as jnp
from jax import lax
from jax.experimental import pallas as pl
from jax.experimental.pallas import tpu as pltpu  # noqa: F401  (no TPU-specific params needed)

HIDDEN = 32                 # hidden_dim
NUM_HEADS = 8
HEAD_DIM = HIDDEN // NUM_HEADS
FFN_DIM = 4 * HIDDEN        # 128
LN_EPS = 1e-5
BATCH = 8

# ---- parameter-slab layout (row offsets) ----
# w32 slab: [168, 32]  = W_av (32 rows) | W2 (128 rows) | 8 vector rows
_VEC0 = HIDDEN + FFN_DIM            # 160: first vector row
_W32_ROWS = _VEC0 + 8               # 168 (multiple of 8)
# w128 slab: [40, 128] = W1 (32 rows) | b1 (1 row) | padding
_W128_ROWS = HIDDEN + 8             # 40  (multiple of 8)


def _layernorm(x, gamma, beta):
    mu = jnp.mean(x, axis=-1, keepdims=True)
    var = jnp.mean((x - mu) * (x - mu), axis=-1, keepdims=True)
    return (x - mu) * lax.rsqrt(var + LN_EPS) * gamma + beta


def _gelu_exact(x):
    # nn.GELU() default: exact erf formulation
    return 0.5 * x * (1.0 + lax.erf(x * (1.0 / math.sqrt(2.0))))


def self_attention_block_kernel(x_ref, w32_ref, w128_ref, o_ref):
    H, F = HIDDEN, FFN_DIM
    x = x_ref[...].astype(jnp.float32)                 # [B, 32]

    # ---- unpack parameter slabs (static sublane slices, zero extra DMAs) ----
    w_av  = w32_ref[0:H, :]                            # [32, 32]   == Wv @ Wo
    w2    = w32_ref[H:H + F, :]                        # [128, 32]
    ln1_g = w32_ref[_VEC0 + 0:_VEC0 + 1, :]            # [1, 32]
    ln1_b = w32_ref[_VEC0 + 1:_VEC0 + 2, :]
    ln2_g = w32_ref[_VEC0 + 2:_VEC0 + 3, :]
    ln2_b = w32_ref[_VEC0 + 3:_VEC0 + 4, :]
    b_av  = w32_ref[_VEC0 + 4:_VEC0 + 5, :]            # == bv @ Wo + bo
    b2    = w32_ref[_VEC0 + 5:_VEC0 + 6, :]
    w1    = w128_ref[0:H, :]                           # [32, 128]
    b1    = w128_ref[H:H + 1, :]                       # [1, 128]

    # ---- LayerNorm -> attention (seq_len == 1: softmax over a single key is
    #      exactly 1, so attention output == V; the V-projection and the output
    #      projection are folded into the single matmul W_av) ----
    xn = _layernorm(x, ln1_g, ln1_b)
    attn_out = jnp.dot(xn, w_av, preferred_element_type=jnp.float32) + b_av
    h = x + attn_out                                   # residual

    # ---- LayerNorm -> FFN (Linear -> GELU -> Linear); dropout = eval identity ----
    hn = _layernorm(h, ln2_g, ln2_b)
    u = jnp.dot(hn, w1, preferred_element_type=jnp.float32) + b1
    u = _gelu_exact(u)
    f = jnp.dot(u, w2, preferred_element_type=jnp.float32) + b2

    # ---- residual ----
    o_ref[...] = (h + f).astype(o_ref.dtype)


def self_attention_block(x, w32, w128):
    """x: [B, 32] f32; w32: [168, 32] f32; w128: [40, 128] f32 -> [B, 32] f32."""
    B, H = x.shape
    return pl.pallas_call(
        self_attention_block_kernel,
        out_shape=jax.ShapeDtypeStruct((B, H), x.dtype),
        # No grid: every operand is a single full-array VMEM block (~110 KiB total),
        # comfortably under the default scoped VMEM limit — no explicit cap needed.
    )(x, w32, w128)


def make_params(key):
    """Deterministic synthetic parameters matching the PyTorch module shapes.

    PyTorch stores Linear / in_proj weights as [out, in]; here they are kept
    pre-transposed ([in, out]) so math is y = x @ W.  Biases are [1, out] rows.
    """
    ks = jax.random.split(key, 8)
    s = 0.05
    H, F = HIDDEN, FFN_DIM

    # MHA in_proj_weight is [3H, H]; split into q/k/v and transpose.
    in_proj_w = s * jax.random.normal(ks[0], (3 * H, H), jnp.float32)
    in_proj_b = s * jax.random.normal(ks[1], (3 * H,), jnp.float32)
    wq, wk, wv = (in_proj_w[0:H].T, in_proj_w[H:2 * H].T, in_proj_w[2 * H:].T)
    bq, bk, bv = (in_proj_b[0:H].reshape(1, H),
                  in_proj_b[H:2 * H].reshape(1, H),
                  in_proj_b[2 * H:].reshape(1, H))

    return {
        "ln1_g": jnp.ones((1, H), jnp.float32),
        "ln1_b": jnp.zeros((1, H), jnp.float32),
        "wq": wq, "wk": wk, "wv": wv, "bq": bq, "bk": bk, "bv": bv,
        "wo": (s * jax.random.normal(ks[2], (H, H), jnp.float32)).T,
        "bo": (s * jax.random.normal(ks[3], (H,), jnp.float32)).reshape(1, H),
        "ln2_g": jnp.ones((1, H), jnp.float32),
        "ln2_b": jnp.zeros((1, H), jnp.float32),
        "w1": (s * jax.random.normal(ks[4], (F, H), jnp.float32)).T,   # [H, 4H]
        "b1": (s * jax.random.normal(ks[5], (F,), jnp.float32)).reshape(1, F),
        "w2": (s * jax.random.normal(ks[6], (H, F), jnp.float32)).T,   # [4H, H]
        "b2": (s * jax.random.normal(ks[7], (H,), jnp.float32)).reshape(1, H),
    }


def pack_params(p):
    """Fold the attention projections and pack everything into two slabs."""
    H, F = HIDDEN, FFN_DIM
    w_av = p["wv"] @ p["wo"]                    # [32, 32]
    b_av = p["bv"] @ p["wo"] + p["bo"]          # [1, 32]

    w32 = jnp.zeros((_W32_ROWS, H), jnp.float32)
    w32 = w32.at[0:H, :].set(w_av)
    w32 = w32.at[H:H + F, :].set(p["w2"])
    w32 = w32.at[_VEC0 + 0].set(p["ln1_g"].reshape(H))
    w32 = w32.at[_VEC0 + 1].set(p["ln1_b"].reshape(H))
    w32 = w32.at[_VEC0 + 2].set(p["ln2_g"].reshape(H))
    w32 = w32.at[_VEC0 + 3].set(p["ln2_b"].reshape(H))
    w32 = w32.at[_VEC0 + 4].set(b_av.reshape(H))
    w32 = w32.at[_VEC0 + 5].set(p["b2"].reshape(H))

    w128 = jnp.zeros((_W128_ROWS, F), jnp.float32)
    w128 = w128.at[0:H, :].set(p["w1"])
    w128 = w128.at[H].set(p["b1"].reshape(F))
    return w32, w128


def reference(x, p):
    """Pure-JAX reference of the PyTorch forward (eval mode), unfolded path."""
    def ln(v, g, b):
        mu = jnp.mean(v, -1, keepdims=True)
        var = jnp.mean((v - mu) ** 2, -1, keepdims=True)
        return (v - mu) / jnp.sqrt(var + LN_EPS) * g + b

    B = x.shape[0]
    xn = ln(x, p["ln1_g"], p["ln1_b"])
    q = (xn @ p["wq"] + p["bq"]).reshape(B, NUM_HEADS, HEAD_DIM)
    k = (xn @ p["wk"] + p["bk"]).reshape(B, NUM_HEADS, HEAD_DIM)
    v = (xn @ p["wv"] + p["bv"]).reshape(B, NUM_HEADS, HEAD_DIM)
    scores = jnp.sum(q * k, -1, keepdims=True) / math.sqrt(HEAD_DIM)  # [B, nh, 1 key]
    attn_w = jax.nn.softmax(scores, axis=-1)                          # == 1 (single key)
    attn = (attn_w * v).reshape(B, HIDDEN)
    attn_out = attn @ p["wo"] + p["bo"]
    h = x + attn_out
    hn = ln(h, p["ln2_g"], p["ln2_b"])
    u = hn @ p["w1"] + p["b1"]
    u = 0.5 * u * (1.0 + lax.erf(u / math.sqrt(2.0)))
    f = u @ p["w2"] + p["b2"]
    return h + f


if __name__ == "__main__":
    key = jax.random.PRNGKey(0)
    kx, kp = jax.random.split(key)
    x = jax.random.normal(kx, (BATCH, HIDDEN), jnp.float32)
    params = make_params(kp)
    w32, w128 = pack_params(params)

    out = self_attention_block(x, w32, w128)
    out = jax.block_until_ready(out)

    ref = reference(x, params)
    assert out.shape == (BATCH, HIDDEN)
    assert jnp.allclose(out, ref, atol=1e-5, rtol=1e-5), "mismatch vs reference"
    print("KERNEL_OK")
</pallas_src>

<mosaic_0001>
module attributes {stable_mosaic.version = 11 : i64} {
  func.func @self_attention_block_kernel(%arg0: memref<8x32xf32, #tpu.memory_space<vmem>>, %arg1: memref<168x32xf32, #tpu.memory_space<vmem>>, %arg2: memref<40x128xf32, #tpu.memory_space<vmem>>, %arg3: memref<8x32xf32, #tpu.memory_space<vmem>>) attributes {dimension_semantics = [], scalar_prefetch = 0 : i64, scratch_operands = 0 : i64, tpu.core_type = #tpu.core_type<tc>} {
    %c0 = arith.constant 0 : index
    %c0_0 = arith.constant 0 : index
    %0 = vector.load %arg0[%c0, %c0_0] : memref<8x32xf32, #tpu.memory_space<vmem>>, vector<8x32xf32>
    %c0_1 = arith.constant 0 : index
    %c0_2 = arith.constant 0 : index
    %1 = vector.load %arg1[%c0_1, %c0_2] : memref<168x32xf32, #tpu.memory_space<vmem>>, vector<32x32xf32>
    %c32 = arith.constant 32 : index
    %c0_3 = arith.constant 0 : index
    %2 = vector.load %arg1[%c32, %c0_3] : memref<168x32xf32, #tpu.memory_space<vmem>>, vector<128x32xf32>
    %c160 = arith.constant 160 : index
    %c0_4 = arith.constant 0 : index
    %3 = vector.load %arg1[%c160, %c0_4] : memref<168x32xf32, #tpu.memory_space<vmem>>, vector<1x32xf32>
    %c161 = arith.constant 161 : index
    %c0_5 = arith.constant 0 : index
    %4 = vector.load %arg1[%c161, %c0_5] : memref<168x32xf32, #tpu.memory_space<vmem>>, vector<1x32xf32>
    %c162 = arith.constant 162 : index
    %c0_6 = arith.constant 0 : index
    %5 = vector.load %arg1[%c162, %c0_6] : memref<168x32xf32, #tpu.memory_space<vmem>>, vector<1x32xf32>
    %c163 = arith.constant 163 : index
    %c0_7 = arith.constant 0 : index
    %6 = vector.load %arg1[%c163, %c0_7] : memref<168x32xf32, #tpu.memory_space<vmem>>, vector<1x32xf32>
    %c164 = arith.constant 164 : index
    %c0_8 = arith.constant 0 : index
    %7 = vector.load %arg1[%c164, %c0_8] : memref<168x32xf32, #tpu.memory_space<vmem>>, vector<1x32xf32>
    %c165 = arith.constant 165 : index
    %c0_9 = arith.constant 0 : index
    %8 = vector.load %arg1[%c165, %c0_9] : memref<168x32xf32, #tpu.memory_space<vmem>>, vector<1x32xf32>
    %c0_10 = arith.constant 0 : index
    %c0_11 = arith.constant 0 : index
    %9 = vector.load %arg2[%c0_10, %c0_11] : memref<40x128xf32, #tpu.memory_space<vmem>>, vector<32x128xf32>
    %c32_12 = arith.constant 32 : index
    %c0_13 = arith.constant 0 : index
    %10 = vector.load %arg2[%c32_12, %c0_13] : memref<40x128xf32, #tpu.memory_space<vmem>>, vector<1x128xf32>
    %cst = arith.constant dense<0.000000e+00> : vector<8xf32>
    %11 = vector.multi_reduction <add>, %0, %cst [1] : vector<8x32xf32> to vector<8xf32>
    %12 = vector.shape_cast %11 : vector<8xf32> to vector<8x1xf32>
    %cst_14 = arith.constant 3.200000e+01 : f32
    %13 = vector.broadcast %cst_14 : f32 to vector<8x1xf32>
    %14 = arith.divf %12, %13 : vector<8x1xf32>
    %15 = vector.broadcast %14 : vector<8x1xf32> to vector<8x32xf32>
    %16 = arith.subf %0, %15 : vector<8x32xf32>
    %17 = vector.broadcast %14 : vector<8x1xf32> to vector<8x32xf32>
    %18 = arith.subf %0, %17 : vector<8x32xf32>
    %19 = arith.mulf %16, %18 : vector<8x32xf32>
    %cst_15 = arith.constant dense<0.000000e+00> : vector<8xf32>
    %20 = vector.multi_reduction <add>, %19, %cst_15 [1] : vector<8x32xf32> to vector<8xf32>
    %21 = vector.shape_cast %20 : vector<8xf32> to vector<8x1xf32>
    %cst_16 = arith.constant 3.200000e+01 : f32
    %22 = vector.broadcast %cst_16 : f32 to vector<8x1xf32>
    %23 = arith.divf %21, %22 : vector<8x1xf32>
    %24 = vector.broadcast %14 : vector<8x1xf32> to vector<8x32xf32>
    %25 = arith.subf %0, %24 : vector<8x32xf32>
    %cst_17 = arith.constant 9.99999974E-6 : f32
    %26 = vector.broadcast %cst_17 : f32 to vector<8x1xf32>
    %27 = arith.addf %23, %26 : vector<8x1xf32>
    %28 = math.rsqrt %27 : vector<8x1xf32>
    %29 = vector.broadcast %28 : vector<8x1xf32> to vector<8x32xf32>
    %30 = arith.mulf %25, %29 : vector<8x32xf32>
    %31 = vector.broadcast %3 : vector<1x32xf32> to vector<8x32xf32>
    %32 = arith.mulf %30, %31 : vector<8x32xf32>
    %33 = vector.broadcast %4 : vector<1x32xf32> to vector<8x32xf32>
    %34 = arith.addf %32, %33 : vector<8x32xf32>
    %cst_18 = arith.constant dense<0.000000e+00> : vector<8x32xf32>
    %35 = tpu.matmul %34, %1, %cst_18 {dimension_numbers = #tpu.dot_dimension_numbers<[1], [0], [0], [1], [0, 0, 1, 1], [], []>} : vector<8x32xf32>, vector<32x32xf32>, vector<8x32xf32> -> vector<8x32xf32>
    %36 = vector.broadcast %7 : vector<1x32xf32> to vector<8x32xf32>
    %37 = arith.addf %35, %36 : vector<8x32xf32>
    %38 = arith.addf %0, %37 : vector<8x32xf32>
    %cst_19 = arith.constant dense<0.000000e+00> : vector<8xf32>
    %39 = vector.multi_reduction <add>, %38, %cst_19 [1] : vector<8x32xf32> to vector<8xf32>
    %40 = vector.shape_cast %39 : vector<8xf32> to vector<8x1xf32>
    %cst_20 = arith.constant 3.200000e+01 : f32
    %41 = vector.broadcast %cst_20 : f32 to vector<8x1xf32>
    %42 = arith.divf %40, %41 : vector<8x1xf32>
    %43 = vector.broadcast %42 : vector<8x1xf32> to vector<8x32xf32>
    %44 = arith.subf %38, %43 : vector<8x32xf32>
    %45 = vector.broadcast %42 : vector<8x1xf32> to vector<8x32xf32>
    %46 = arith.subf %38, %45 : vector<8x32xf32>
    %47 = arith.mulf %44, %46 : vector<8x32xf32>
    %cst_21 = arith.constant dense<0.000000e+00> : vector<8xf32>
    %48 = vector.multi_reduction <add>, %47, %cst_21 [1] : vector<8x32xf32> to vector<8xf32>
    %49 = vector.shape_cast %48 : vector<8xf32> to vector<8x1xf32>
    %cst_22 = arith.constant 3.200000e+01 : f32
    %50 = vector.broadcast %cst_22 : f32 to vector<8x1xf32>
    %51 = arith.divf %49, %50 : vector<8x1xf32>
    %52 = vector.broadcast %42 : vector<8x1xf32> to vector<8x32xf32>
    %53 = arith.subf %38, %52 : vector<8x32xf32>
    %cst_23 = arith.constant 9.99999974E-6 : f32
    %54 = vector.broadcast %cst_23 : f32 to vector<8x1xf32>
    %55 = arith.addf %51, %54 : vector<8x1xf32>
    %56 = math.rsqrt %55 : vector<8x1xf32>
    %57 = vector.broadcast %56 : vector<8x1xf32> to vector<8x32xf32>
    %58 = arith.mulf %53, %57 : vector<8x32xf32>
    %59 = vector.broadcast %5 : vector<1x32xf32> to vector<8x32xf32>
    %60 = arith.mulf %58, %59 : vector<8x32xf32>
    %61 = vector.broadcast %6 : vector<1x32xf32> to vector<8x32xf32>
    %62 = arith.addf %60, %61 : vector<8x32xf32>
    %cst_24 = arith.constant dense<0.000000e+00> : vector<8x128xf32>
    %63 = tpu.matmul %62, %9, %cst_24 {dimension_numbers = #tpu.dot_dimension_numbers<[1], [0], [0], [1], [0, 0, 1, 1], [], []>} : vector<8x32xf32>, vector<32x128xf32>, vector<8x128xf32> -> vector<8x128xf32>
    %64 = vector.broadcast %10 : vector<1x128xf32> to vector<8x128xf32>
    %65 = arith.addf %63, %64 : vector<8x128xf32>
    %cst_25 = arith.constant 5.000000e-01 : f32
    %66 = vector.broadcast %cst_25 : f32 to vector<8x128xf32>
    %67 = arith.mulf %66, %65 : vector<8x128xf32>
    %cst_26 = arith.constant 0.707106769 : f32
    %68 = vector.broadcast %cst_26 : f32 to vector<8x128xf32>
    %69 = arith.mulf %65, %68 : vector<8x128xf32>
    %70 = math.erf %69 : vector<8x128xf32>
    %cst_27 = arith.constant 1.000000e+00 : f32
    %71 = vector.broadcast %cst_27 : f32 to vector<8x128xf32>
    %72 = arith.addf %71, %70 : vector<8x128xf32>
    %73 = arith.mulf %67, %72 : vector<8x128xf32>
    %cst_28 = arith.constant dense<0.000000e+00> : vector<8x32xf32>
    %74 = tpu.matmul %73, %2, %cst_28 {dimension_numbers = #tpu.dot_dimension_numbers<[1], [0], [0], [1], [0, 0, 1, 1], [], []>} : vector<8x128xf32>, vector<128x32xf32>, vector<8x32xf32> -> vector<8x32xf32>
    %75 = vector.broadcast %8 : vector<1x32xf32> to vector<8x32xf32>
    %76 = arith.addf %74, %75 : vector<8x32xf32>
    %77 = arith.addf %38, %76 : vector<8x32xf32>
    %c0_29 = arith.constant 0 : index
    %c0_30 = arith.constant 0 : index
    %78 = vector.load %arg3[%c0_29, %c0_30] : memref<8x32xf32, #tpu.memory_space<vmem>>, vector<8x32xf32>
    tpu.vector_store %arg3[%c0_29, %c0_30], %77 {strides = array<i32>} : memref<8x32xf32, #tpu.memory_space<vmem>>, vector<8x32xf32>,
    return
  }
}

</mosaic_0001>

<bundles_post_ra>
// kernel: tpu_custom_call.1
= control target key start
LH: loop header
LB: loop body
LE: loop exit
PB: predicated region body
PF: predicated region fallthrough
CT: control target
= control target key end

     0   :  { %vm47_vm0 = vcmask 261120   ;;  %s667_s0 = inlined_call_operand.vmem [shape: f32[8,32], index: 0, kind: input, shape index: {}]   ;;  %s668_s1 = inlined_call_operand.vmem [shape: f32[168,32], index: 1, kind: input, shape index: {}]   ;;  %s669_s2 = inlined_call_operand.vmem [shape: f32[40,128], index: 2, kind: input, shape index: {}]   ;;  %s670_s3 = inlined_call_operand.hbm [shape: f32[8,32], index: 3, kind: output, shape index: {}]  }
   0x1   :  { %v15_v0 = vld [vmem:[%s667_s0] sm:$0xff] }
   0x2   :  { %8 = vsyncpa [#allocation3], 0  ;;  %v48_v1 = vsel %vm47_vm0, %v15_v0, 0.0  ;;  %v16_v7 = vld [vmem:[%s668_s1] sm:$0xff]  ;;  %v17_v8 = vld [vmem:[%s668_s1 + $0x8] sm:$0xff]  ;;  %v508_v10 = vmov 0.0|0.0  }
   0x3   :  { %49 = vadd.xlane.f32.xlu0 %v48_v1  ;;  %v18_v9 = vld [vmem:[%s668_s1 + $0x10] sm:$0xff]  ;;  %438 = vmatprep.subr.bf16.mxu1 %v508_v10  ;;  %v439_v11 = vpack.c.bf16 %v17_v8, %v16_v7  ;;  %v19_v12 = vld [vmem:[%s668_s1 + $0x18] sm:$0xff]  ;;  %vm509_vm1 = vmmov 0   ;;  %v510_v13 = vmov 0.0   ;;  %v345_v19 = vld [vmem:[%s668_s1 + $0xa0] ss:$0 sm:$0xff] }
   0x4   :  { %389 = vmatprep.mubr.msk.f32.mxu1 %vm509_vm1, %v510_v13  ;;  %450 = vmatprep.subr.bf16.mxu0 %v508_v10  ;;  %v442_v14 = vpack.c.bf16 %v19_v12, %v18_v9  ;;  %v346_v21 = vld [vmem:[%s668_s1 + $0xa1] ss:$0 sm:$0xff]  ;;  %v347_v24 = vld [vmem:[%s668_s1 + $0xa4] ss:$0 sm:$0xff]  ;;  %v43_v36 = vld [vmem:[%s669_s2 + $0x8] sm:$0xff]  ;;  %s511_s19 = smov [#allocation2]  }
   0x5   :  { %435 = vmatprep.mubr.msk.f32.mxu0 %vm509_vm1, %v510_v13  ;;  %440 = vmatpush3.bf16.msra.mxu1 %v439_v11  ;;  %v42_v35 = vld [vmem:[%s669_s2] sm:$0xff]  ;;  %v44_v38 = vld [vmem:[%s669_s2 + $0x10] sm:$0xff]  ;;  %v45_v39 = vld [vmem:[%s669_s2 + $0x18] sm:$0xff]  ;;  %s337_s20 = sshll.u32 %s511_s19, 4  ;;  %s338_s20 = int_to_ptr.vmem [resolvable:$true] %s337_s20 }
   0x6   :  { %441 = vmatprep.subr.bf16.mxu1 %v508_v10  ;;  %v445_v37 = vpack.c.bf16 %v43_v36, %v42_v35  ;;  %v448_v40 = vpack.c.bf16 %v45_v39, %v44_v38  ;;  %v20_v41 = vld [vmem:[%s668_s1 + $0x20] sm:$0xff]  ;;  %v21_v42 = vld [vmem:[%s668_s1 + $0x28] sm:$0xff]  ;;  %v22_v43 = vld [vmem:[%s668_s1 + $0x30] sm:$0xff]  ;;  %p489_p1 = scmp.lt.s32.totalorder %s338_s20, %s338_s20 }
   0x7   :  { %v451_v44 = vpack.c.bf16 %v21_v42, %v20_v41  ;;  %v23_v45 = vld [vmem:[%s668_s1 + $0x38] sm:$0xff]  ;;  %v24_v47 = vld [vmem:[%s668_s1 + $0x40] sm:$0xff]  ;;  %v25_v48 = vld [vmem:[%s668_s1 + $0x48] sm:$0xff] }
   0x8   :  { %v454_v46 = vpack.c.bf16 %v23_v45, %v22_v43  ;;  %v457_v49 = vpack.c.bf16 %v25_v48, %v24_v47  ;;  %v349_v54 = vld [vmem:[%s668_s1 + $0xa2] ss:$0 sm:$0xff]  ;;  %v350_v56 = vld [vmem:[%s668_s1 + $0xa3] ss:$0 sm:$0xff]  ;;  %v26_v59 = vld [vmem:[%s668_s1 + $0x50] sm:$0xff] }
   0x9   :  { %443 = vmatpush3.bf16.msra.mxu1 %v442_v14  ;;  %452 = vmatpush3.bf16.msra.mxu0 %v451_v44  ;;  %v27_v60 = vld [vmem:[%s668_s1 + $0x58] sm:$0xff]  ;;  %v28_v62 = vld [vmem:[%s668_s1 + $0x60] sm:$0xff]  ;;  %v29_v63 = vld [vmem:[%s668_s1 + $0x68] sm:$0xff] }
   0xa   :  { %444 = vmatprep.subr.bf16.mxu1 %v508_v10  ;;  %453 = vmatprep.subr.bf16.mxu0 %v508_v10  ;;  %v460_v61 = vpack.c.bf16 %v27_v60, %v26_v59  ;;  %v30_v1 = vld [vmem:[%s668_s1 + $0x70] sm:$0xff]  ;;  %v35_v8 = vld [vmem:[%s668_s1 + $0x98] sm:$0xff]  ;;  %v351_v11 = vld [vmem:[%s669_s2 + $0x20] ss:$0 sm:$0xff]  ;;  %s484_s2 = scalar_lea.vmem %s338_s20, 128 }
   0xb   :  { %v34_v7 = vld [vmem:[%s668_s1 + $0x90] sm:$0xff]  ;;  %p485_p0 = scmp.ne.s32.totalorder %s338_s20, %s484_s2  ;;  %p490_p2 = scmp.lt.s32.totalorder %s484_s2, %s484_s2 }
   0xc   :  { %v472_v9 = vpack.c.bf16 %v35_v8, %v34_v7 }
   0xd   :  { %455 = vmatpush3.bf16.msra.mxu0 %v454_v46  ;;  %p491_p3 = por %p490_p2, %p489_p1 }
   0xe   :  { %456 = vmatprep.subr.bf16.mxu0 %v508_v10 }
   0xf   :  { %p492_p4 = pnand %p491_p3, %p485_p0 }
  0x11   :  { %458 = vmatpush3.bf16.msra.mxu0 %v457_v49 }
  0x12   :  { %459 = vmatprep.subr.bf16.mxu0 %v508_v10 }
  0x15   :  { %461 = vmatpush3.bf16.msra.mxu0 %v460_v61 }
  0x16   :  { %462 = vmatprep.subr.bf16.mxu0 %v508_v10 }
  0x90   :  { %v50_v2 = vpop.xlane.xlu0 %49 }
  0x91   :  { %v52_v3 = vmul.f32 0.03125, %v50_v2  ;;  %v31_v2 = vld [vmem:[%s668_s1 + $0x78] sm:$0xff] }
  0x93   :  { %v53_v4 = vsub.f32 %v15_v0, %v52_v3  ;;  %v466_v3 = vpack.c.bf16 %v31_v2, %v30_v1 }
  0x95   :  { %v54_v5 = vmul.f32 %v53_v4, %v53_v4 }
  0x97   :  { %v55_v6 = vsel %vm47_vm0, %v54_v5, 0.0  ;;  %v33_v5 = vld [vmem:[%s668_s1 + $0x88] sm:$0xff] }
  0x98   :  { %56 = vadd.xlane.f32.xlu0 %v55_v6 }
 0x125   :  { %v57_v15 = vpop.xlane.xlu0 %56 }
 0x126   :  { %v58_v16 = vmul.f32 0.03125, %v57_v15 }
 0x128   :  { %v59_v17 = vadd.f32 1e-05, %v58_v16 }
 0x12a   :  { %478 = vrsqrt.f32 %v59_v17 }
 0x134   :  { %v479_v18 = vpop.eup %478 }
 0x135   :  { %v61_v20 = vmul.f32 %v479_v18, %v53_v4  ;;  %v32_v4 = vld [vmem:[%s668_s1 + $0x80] sm:$0xff] }
 0x136   :  { %v469_v6 = vpack.c.bf16 %v33_v5, %v32_v4 }
 0x137   :  { %v66_v22 = vmul.f32 %v345_v19, %v61_v20  ;;  %v353_v19 = vld [vmem:[%s668_s1 + $0xa5] ss:$0 sm:$0xff] }
 0x139   :  { %v71_v23 = vadd.f32 %v346_v21, %v66_v22 }
 0x13b   :  { %390 = vmatmul.mubr.msk.f32.vlgmr.msra.gmra.mrb[0].mxu1 %vm47_vm0, %v71_v23 }
 0x13c   :  { %400 = vmatprep.mubr.msk.f32.mxu1 %vm509_vm1, %v510_v13  ;;  %446 = vmatpush3.bf16.msra.mxu1 %v445_v37 }
 0x13d   :  { %447 = vmatprep.subr.bf16.mxu1 %v508_v10 }
 0x140   :  { %449 = vmatpush3.bf16.msra.mxu1 %v448_v40 }
 0x20e   :  { %v145_v25 = vpop.f32.mrb[0].mxu1 }
 0x20f   :  { %v146_v26 = vadd.f32 %v347_v24, %v145_v25  ;;  %v391_v27 = vpop.f32.mrb[1].mxu1 }
 0x211   :  { %v566_v28 = vadd.f32 %v146_v26, %v15_v0  ;;  %v463_v0 = vpack.c.bf16 %v29_v63, %v28_v62 }
 0x213   :  { %v150_v29 = vsel %vm47_vm0, %v566_v28, 0.0  ;;  %464 = vmatpush3.bf16.msra.mxu0 %v463_v0 }
 0x214   :  { %151 = vadd.xlane.f32.xlu1 %v150_v29  ;;  %465 = vmatprep.subr.bf16.mxu0 %v508_v10 }
 0x217   :  { %467 = vmatpush3.bf16.msra.mxu0 %v466_v3 }
 0x218   :  { %468 = vmatprep.subr.bf16.mxu0 %v508_v10 }
 0x21b   :  { %470 = vmatpush3.bf16.msra.mxu0 %v469_v6 }
 0x21c   :  { %471 = vmatprep.subr.bf16.mxu0 %v508_v10 }
 0x21f   :  { %473 = vmatpush3.bf16.msra.mxu0 %v472_v9 }
 0x2a1   :  { %v152_v30 = vpop.xlane.xlu1 %151 }
 0x2a2   :  { %v153_v31 = vmul.f32 0.03125, %v152_v30 }
 0x2a4   :  { %v154_v32 = vsub.f32 %v566_v28, %v153_v31 }
 0x2a6   :  { %v155_v33 = vmul.f32 %v154_v32, %v154_v32 }
 0x2a8   :  { %v156_v34 = vsel %vm47_vm0, %v155_v33, 0.0 }
 0x2a9   :  { %157 = vadd.xlane.f32.xlu1 %v156_v34 }
 0x336   :  { %v158_v50 = vpop.xlane.xlu1 %157 }
 0x337   :  { %v159_v51 = vmul.f32 0.03125, %v158_v50 }
 0x339   :  { %v160_v52 = vadd.f32 1e-05, %v159_v51 }
 0x33b   :  { %480 = vrsqrt.f32 %v160_v52 }
 0x345   :  { %v481_v53 = vpop.eup %480 }
 0x346   :  { %v162_v55 = vmul.f32 %v481_v53, %v154_v32 }
 0x348   :  { %v167_v57 = vmul.f32 %v349_v54, %v162_v55 }
 0x34a   :  { %v172_v58 = vadd.f32 %v350_v56, %v167_v57 }
 0x34c   :  { %401 = vmatmul.mubr.msk.f32.vlgmr.msra.gmra.mrb[2].mxu1 %vm47_vm0, %v172_v58 }
 0x41f   :  { %v246_v12 = vpop.f32.mrb[2].mxu1 }
 0x420   :  { %v247_v13 = vadd.f32 %v351_v11, %v246_v12  ;;  %v402_v14 = vpop.f32.mrb[3].mxu1 }
 0x422   :  { %v251_v15 = vmul.f32 0.70710677, %v247_v13  ;;  %v250_v16 = vmul.f32 0.5, %v247_v13 }
 0x424   :  { %482 = verf.f32 %v251_v15 }
 0x42e   :  { %v483_v10 = vpop.eup %482 }
 0x42f   :  { %v253_v17 = vadd.f32 1.0, %v483_v10 }
 0x431   :  { %v254_v18 = vmul.f32 %v253_v17, %v250_v16 }
 0x433   :  { %436 = vmatmul.mubr.f32.vlgmr.msra.gmra.mrb[0].mxu0 %v254_v18 }
 0x506   :  { %v325_v20 = vpop.f32.mrb[0].mxu0 }
 0x507   :  { %v326_v21 = vadd.f32 %v353_v19, %v325_v20  ;;  %v437_v22 = vpop.f32.mrb[1].mxu0 }
 0x509   :  { %v329_v23 = vadd.f32 %v326_v21, %v566_v28 }
 0x50b   :  { %330 = vst.msk [vmem:[#allocation2] sm:$0xff] %vm47_vm0, %v329_v23 }
 0x50c   :  { %495 = shalt.err (!%p492_p4)
}
 0x50d   :  { %s496_s1 = scalar_lea.hbm %s670_s3, 128 }
 0x50e   :  { %p497_p5 = scmp.ne.s32.totalorder %s670_s3, %s496_s1  ;;  %p500_p6 = scmp.lt.u32.totalorder %s496_s1, %s670_s3 }
 0x510   :  { %p502_p7 = pnand %p500_p6, %p497_p5 }
 0x512   :  { %505 = shalt.err (!%p502_p7)
}
 0x513   :  { %340 = dma.vmem_to_hbm [thread:$0]  %s338_s20, 128, %s670_s3, [#allocation3]  }
 0x514   :  { %506 = dma.done.wait [#allocation3], 128  }
 0x515   :  { %507 = vsyncadd [#allocation3], 4294967168 }
 0x516   :  { %344 = vsyncpa [#allocation3], 1 }

</bundles_post_ra>
